<compile_context>
chip_gen: v5e
topology: v5e:2x2
jax: 0.10.0
libtpu: 0.0.40
codegen_flags: <defaults>
</compile_context>

<pallas_src>
import functools

import jax
import jax.numpy as jnp
from jax.experimental import pallas as pl
from jax.experimental.pallas import tpu as pltpu

LN_EPS = 1e-5  # torch.nn.LayerNorm default


def _residual_block_kernel(*refs, use_dropout, return_layernorm):
    n_in = 5 + (1 if use_dropout else 0)
    x_ref, gamma_ref, beta_ref, w_ref, b_ref = refs[:5]
    mask_ref = refs[5] if use_dropout else None
    out_ref = refs[n_in]
    ln_ref = refs[n_in + 1] if return_layernorm else None

    x = x_ref[...]  # native dtype (no blanket f32 upcast)

    # ---- sublayer(input_data): Linear(H, H) on the MXU, f32 accumulation ----
    y = jnp.dot(x, w_ref[...], preferred_element_type=jnp.float32)
    y = y + b_ref[...].astype(jnp.float32)

    # ---- dropout: precomputed, pre-scaled keep-mask (keep/(1-p)) -------------
    if use_dropout:
        y = y * mask_ref[...]

    # ---- residual connection (f32 math, cast on store) ----------------------
    out_ref[...] = (x.astype(jnp.float32) + y).astype(out_ref.dtype)

    # ---- LayerNorm(input_data): forward no-op in the module; optional output
    if return_layernorm:
        xf = x.astype(jnp.float32)
        mean = jnp.mean(xf, axis=-1, keepdims=True)
        var = jnp.mean(jnp.square(xf - mean), axis=-1, keepdims=True)
        ln = (xf - mean) * jax.lax.rsqrt(var + LN_EPS) * gamma_ref[...] + beta_ref[...]
        ln_ref[...] = ln.astype(ln_ref.dtype)


def _dropout_mask(seed, dropout_rate, shape, dtype=jnp.float32):
    """Pre-scaled keep mask: keep w.p. (1-p), value 1/(1-p); 0 otherwise."""
    keep_prob = 1.0 - float(dropout_rate)
    keep = jax.random.bernoulli(jax.random.PRNGKey(seed), keep_prob, shape)
    return keep.astype(dtype) * jnp.asarray(1.0 / keep_prob, dtype)


def residual_block(x, gamma, beta, w, b, *, dropout_rate=0.1, training=True,
                   seed=0, return_layernorm=False, row_tile=512):
    """x: [B, S, H]. Returns residual_out [B,S,H] (and LN(x) [B,S,H] if requested)."""
    B, S, H = x.shape
    R = B * S
    x2 = x.reshape(R, H)
    gamma2 = gamma.reshape(1, H).astype(jnp.float32)
    beta2 = beta.reshape(1, H).astype(jnp.float32)
    b2 = b.reshape(1, H)

    use_dropout = bool(training) and float(dropout_rate) > 0.0

    # Row-tile: keeps (inputs + outputs) * double-buffering bounded and generation
    # independent (fits comfortably under the v7x 64 MiB / 32 MiB-scoped VMEM budget).
    TM = min(int(row_tile), R)
    grid = (pl.cdiv(R, TM),)

    tile_map = lambda i: (i, 0)    # x / mask / outputs advance along the row axis
    const_map = lambda i: (0, 0)   # gamma/beta/W/b stay VMEM-resident across steps

    in_specs = [
        pl.BlockSpec((TM, H), tile_map),   # x
        pl.BlockSpec((1, H), const_map),   # LayerNorm gamma
        pl.BlockSpec((1, H), const_map),   # LayerNorm beta
        pl.BlockSpec((H, H), const_map),   # sublayer weight
        pl.BlockSpec((1, H), const_map),   # sublayer bias
    ]
    inputs = [x2, gamma2, beta2, w, b2]

    if use_dropout:
        # TODO(synk): on real TPU hardware the mask would be generated in-kernel with
        # pltpu.prng_seed/prng_random_bits (perturbed by pl.program_id) to avoid this
        # extra HBM stream; those primitives have no CPU/interpret lowering here.
        mask = _dropout_mask(seed, dropout_rate, (R, H))
        in_specs.append(pl.BlockSpec((TM, H), tile_map))
        inputs.append(mask)

    out_shape = [jax.ShapeDtypeStruct((R, H), x.dtype)]
    out_specs = [pl.BlockSpec((TM, H), tile_map)]
    if return_layernorm:
        out_shape.append(jax.ShapeDtypeStruct((R, H), x.dtype))  # x.dtype, not f32
        out_specs.append(pl.BlockSpec((TM, H), tile_map))

    kernel = functools.partial(_residual_block_kernel,
                               use_dropout=use_dropout,
                               return_layernorm=bool(return_layernorm))

    results = pl.pallas_call(
        kernel,
        grid=grid,
        in_specs=in_specs,
        out_specs=out_specs,
        out_shape=out_shape,
        compiler_params=pltpu.CompilerParams(
            dimension_semantics=("parallel",)),   # rows are independent -> megacore shard
    )(*inputs)

    if return_layernorm:
        out, ln = results
        return out.reshape(B, S, H), ln.reshape(B, S, H)
    (out,) = results
    return out.reshape(B, S, H)


if __name__ == "__main__":
    # Small shapes consistent with the module: batch=2, seq=8, hidden(input_size)=32
    B, S, H = 2, 8, 32
    key = jax.random.PRNGKey(0)
    kx, kw = jax.random.split(key)

    x = jax.random.normal(kx, (B, S, H), dtype=jnp.float32)

    # Deterministic synthetic parameters (shapes from __init__ / a Linear sublayer).
    gamma = jnp.ones((H,), dtype=jnp.float32)                      # LayerNorm weight
    beta = jnp.zeros((H,), dtype=jnp.float32)                      # LayerNorm bias
    w = 0.02 * jax.random.normal(kw, (H, H), dtype=jnp.float32)    # sublayer Linear weight
    b = jnp.zeros((H,), dtype=jnp.float32)                         # sublayer Linear bias

    # Pure-JAX references
    mean = jnp.mean(x, axis=-1, keepdims=True)
    var = jnp.mean(jnp.square(x - mean), axis=-1, keepdims=True)
    ln_ref = (x - mean) * jax.lax.rsqrt(var + LN_EPS) * gamma + beta
    sub = jnp.einsum("bsh,hk->bsk", x, w) + b
    out_ref = x + sub

    # ---- eval mode (dropout disabled), LN output requested for validation ----
    out_eval, ln_out = residual_block(x, gamma, beta, w, b, dropout_rate=0.1,
                                      training=False, return_layernorm=True)
    out_eval = jax.block_until_ready(out_eval)
    assert jnp.allclose(out_eval, out_ref, atol=1e-5, rtol=1e-5), "residual output mismatch"
    assert jnp.allclose(ln_out, ln_ref, atol=1e-5, rtol=1e-5), "layernorm mismatch"

    # ---- exercise the row-tiled pipeline (grid > 1) ---------------------------
    out_tiled = residual_block(x, gamma, beta, w, b, dropout_rate=0.1,
                               training=False, row_tile=8)
    out_tiled = jax.block_until_ready(out_tiled)
    assert jnp.allclose(out_tiled, out_ref, atol=1e-5, rtol=1e-5), "tiled output mismatch"

    # ---- training mode (dropout active, deterministic host-side mask) --------
    # TODO(synk): PyTorch's exact dropout mask (torch RNG stream) cannot be reproduced;
    #             semantics (drop w.p. p, scale by 1/(1-p)) are reproduced with jax.random.
    p, seed = 0.1, 0
    out_train = residual_block(x, gamma, beta, w, b, dropout_rate=p,
                               training=True, seed=seed)
    out_train = jax.block_until_ready(out_train)
    mask_ref = _dropout_mask(seed, p, (B * S, H)).reshape(B, S, H)
    out_train_ref = x + sub * mask_ref
    assert out_train.shape == (B, S, H)
    assert jnp.allclose(out_train, out_train_ref, atol=1e-5, rtol=1e-5), "training output mismatch"

    print("KERNEL_OK")
</pallas_src>

<mosaic_0001>
module attributes {stable_mosaic.version = 11 : i64} {
  func.func @_residual_block_kernel(%arg0: i32, %arg1: memref<16x32xf32, #tpu.memory_space<vmem>>, %arg2: memref<1x32xf32, #tpu.memory_space<vmem>>, %arg3: memref<1x32xf32, #tpu.memory_space<vmem>>, %arg4: memref<32x32xf32, #tpu.memory_space<vmem>>, %arg5: memref<1x32xf32, #tpu.memory_space<vmem>>, %arg6: memref<16x32xf32, #tpu.memory_space<vmem>>, %arg7: memref<16x32xf32, #tpu.memory_space<vmem>>) attributes {dimension_semantics = [#tpu.dimension_semantics<parallel>], iteration_bounds = array<i64: 1>, scalar_prefetch = 0 : i64, scratch_operands = 0 : i64, tpu.core_type = #tpu.core_type<tc>, window_params = [{transform_indices = @transform_0, window_bounds = array<i64: 16, 32>}, {pipeline_mode = #tpu.pipeline_mode<synchronous>, transform_indices = @transform_1, window_bounds = array<i64: 1, 32>}, {pipeline_mode = #tpu.pipeline_mode<synchronous>, transform_indices = @transform_2, window_bounds = array<i64: 1, 32>}, {pipeline_mode = #tpu.pipeline_mode<synchronous>, transform_indices = @transform_3, window_bounds = array<i64: 32, 32>}, {pipeline_mode = #tpu.pipeline_mode<synchronous>, transform_indices = @transform_4, window_bounds = array<i64: 1, 32>}, {transform_indices = @transform_5, window_bounds = array<i64: 16, 32>}, {transform_indices = @transform_6, window_bounds = array<i64: 16, 32>}]} {
    %c0 = arith.constant 0 : index
    %c0_0 = arith.constant 0 : index
    %0 = vector.load %arg1[%c0, %c0_0] : memref<16x32xf32, #tpu.memory_space<vmem>>, vector<16x32xf32>
    %c0_1 = arith.constant 0 : index
    %c0_2 = arith.constant 0 : index
    %1 = vector.load %arg4[%c0_1, %c0_2] : memref<32x32xf32, #tpu.memory_space<vmem>>, vector<32x32xf32>
    %cst = arith.constant dense<0.000000e+00> : vector<16x32xf32>
    %2 = tpu.matmul %0, %1, %cst {dimension_numbers = #tpu.dot_dimension_numbers<[1], [0], [0], [1], [0, 0, 1, 1], [], []>} : vector<16x32xf32>, vector<32x32xf32>, vector<16x32xf32> -> vector<16x32xf32>
    %c0_3 = arith.constant 0 : index
    %c0_4 = arith.constant 0 : index
    %3 = vector.load %arg5[%c0_3, %c0_4] : memref<1x32xf32, #tpu.memory_space<vmem>>, vector<1x32xf32>
    %4 = vector.broadcast %3 : vector<1x32xf32> to vector<16x32xf32>
    %5 = arith.addf %2, %4 : vector<16x32xf32>
    %6 = arith.addf %0, %5 : vector<16x32xf32>
    %c0_5 = arith.constant 0 : index
    %c0_6 = arith.constant 0 : index
    %7 = vector.load %arg6[%c0_5, %c0_6] : memref<16x32xf32, #tpu.memory_space<vmem>>, vector<16x32xf32>
    tpu.vector_store %arg6[%c0_5, %c0_6], %6 {strides = array<i32>} : memref<16x32xf32, #tpu.memory_space<vmem>>, vector<16x32xf32>,
    %cst_7 = arith.constant dense<0.000000e+00> : vector<16xf32>
    %8 = vector.multi_reduction <add>, %0, %cst_7 [1] : vector<16x32xf32> to vector<16xf32>
    %9 = vector.shape_cast %8 : vector<16xf32> to vector<16x1xf32>
    %cst_8 = arith.constant 3.200000e+01 : f32
    %10 = vector.broadcast %cst_8 : f32 to vector<16x1xf32>
    %11 = arith.divf %9, %10 : vector<16x1xf32>
    %12 = vector.broadcast %11 : vector<16x1xf32> to vector<16x32xf32>
    %13 = arith.subf %0, %12 : vector<16x32xf32>
    %14 = arith.mulf %13, %13 : vector<16x32xf32>
    %cst_9 = arith.constant dense<0.000000e+00> : vector<16xf32>
    %15 = vector.multi_reduction <add>, %14, %cst_9 [1] : vector<16x32xf32> to vector<16xf32>
    %16 = vector.shape_cast %15 : vector<16xf32> to vector<16x1xf32>
    %cst_10 = arith.constant 3.200000e+01 : f32
    %17 = vector.broadcast %cst_10 : f32 to vector<16x1xf32>
    %18 = arith.divf %16, %17 : vector<16x1xf32>
    %19 = vector.broadcast %11 : vector<16x1xf32> to vector<16x32xf32>
    %20 = arith.subf %0, %19 : vector<16x32xf32>
    %cst_11 = arith.constant 9.99999974E-6 : f32
    %21 = vector.broadcast %cst_11 : f32 to vector<16x1xf32>
    %22 = arith.addf %18, %21 : vector<16x1xf32>
    %23 = math.rsqrt %22 : vector<16x1xf32>
    %24 = vector.broadcast %23 : vector<16x1xf32> to vector<16x32xf32>
    %25 = arith.mulf %20, %24 : vector<16x32xf32>
    %c0_12 = arith.constant 0 : index
    %c0_13 = arith.constant 0 : index
    %26 = vector.load %arg2[%c0_12, %c0_13] : memref<1x32xf32, #tpu.memory_space<vmem>>, vector<1x32xf32>
    %27 = vector.broadcast %26 : vector<1x32xf32> to vector<16x32xf32>
    %28 = arith.mulf %25, %27 : vector<16x32xf32>
    %c0_14 = arith.constant 0 : index
    %c0_15 = arith.constant 0 : index
    %29 = vector.load %arg3[%c0_14, %c0_15] : memref<1x32xf32, #tpu.memory_space<vmem>>, vector<1x32xf32>
    %30 = vector.broadcast %29 : vector<1x32xf32> to vector<16x32xf32>
    %31 = arith.addf %28, %30 : vector<16x32xf32>
    %c0_16 = arith.constant 0 : index
    %c0_17 = arith.constant 0 : index
    %32 = vector.load %arg7[%c0_16, %c0_17] : memref<16x32xf32, #tpu.memory_space<vmem>>, vector<16x32xf32>
    tpu.vector_store %arg7[%c0_16, %c0_17], %31 {strides = array<i32>} : memref<16x32xf32, #tpu.memory_space<vmem>>, vector<16x32xf32>,
    return
  }
  func.func @transform_0(%arg0: i32) -> (i32, i32) {
    %c0_i32 = arith.constant 0 : i32
    %c0_i32_0 = arith.constant 0 : i32
    return %arg0, %c0_i32 : i32, i32
  }
  func.func @transform_1(%arg0: i32) -> (i32, i32) {
    %c0_i32 = arith.constant 0 : i32
    %c0_i32_0 = arith.constant 0 : i32
    %c0_i32_1 = arith.constant 0 : i32
    return %c0_i32, %c0_i32_0 : i32, i32
  }
  func.func @transform_2(%arg0: i32) -> (i32, i32) {
    %c0_i32 = arith.constant 0 : i32
    %c0_i32_0 = arith.constant 0 : i32
    %c0_i32_1 = arith.constant 0 : i32
    return %c0_i32, %c0_i32_0 : i32, i32
  }
  func.func @transform_3(%arg0: i32) -> (i32, i32) {
    %c0_i32 = arith.constant 0 : i32
    %c0_i32_0 = arith.constant 0 : i32
    %c0_i32_1 = arith.constant 0 : i32
    return %c0_i32, %c0_i32_0 : i32, i32
  }
  func.func @transform_4(%arg0: i32) -> (i32, i32) {
    %c0_i32 = arith.constant 0 : i32
    %c0_i32_0 = arith.constant 0 : i32
    %c0_i32_1 = arith.constant 0 : i32
    return %c0_i32, %c0_i32_0 : i32, i32
  }
  func.func @transform_5(%arg0: i32) -> (i32, i32) {
    %c0_i32 = arith.constant 0 : i32
    %c0_i32_0 = arith.constant 0 : i32
    return %arg0, %c0_i32 : i32, i32
  }
  func.func @transform_6(%arg0: i32) -> (i32, i32) {
    %c0_i32 = arith.constant 0 : i32
    %c0_i32_0 = arith.constant 0 : i32
    return %arg0, %c0_i32 : i32, i32
  }
}

</mosaic_0001>

<bundles_post_ra>
// kernel: tpu_custom_call.1
= control target key start
LH: loop header
LB: loop body
LE: loop exit
PB: predicated region body
PF: predicated region fallthrough
CT: control target
= control target key end

     0   :  { %12 = vsyncpa [#allocation3], 0  ;;  %s453_s0 = inlined_call_operand.hbm [shape: f32[16,32], index: 0, kind: input, shape index: {}]   ;;  %s454_s1 = inlined_call_operand.hbm [shape: f32[1,32], index: 1, kind: input, shape index: {}]   ;;  %s455_s2 = inlined_call_operand.vmem [shape: f32[1,32], index: 2, kind: input, shape index: {}]   ;;  %s456_s3 = inlined_call_operand.hbm [shape: f32[32,32], index: 3, kind: input, shape index: {}]   ;;  %s457_s4 = inlined_call_operand.vmem [shape: f32[1,32], index: 4, kind: input, shape index: {}]   ;;  %s458_s5 = inlined_call_operand.hbm [shape: f32[16,32], index: 5, kind: output, shape index: {0}]   ;;  %s459_s6 = inlined_call_operand.hbm [shape: f32[16,32], index: 6, kind: output, shape index: {1}]  }
   0x1   :  { %13 = vsyncpa [#allocation6], 0 }
   0x2   :  { %14 = vsyncpa [#allocation4], 0  ;;  %s34_s23 = sshll.u32 %s454_s1, 4  ;;  %s35_s23 = int_to_ptr.hbm [resolvable:$true] %s34_s23 }
   0x3   :  { %15 = vsyncpa [#allocation10], 0  ;;  %s367_s24 = smov [#allocation5]   ;;  %s20_s28 = sshll.u32 %s453_s0, 4  ;;  %s21_s28 = int_to_ptr.hbm [resolvable:$true] %s20_s28 }
   0x4   :  { %s36_s25 = sshll.u32 %s367_s24, 4  ;;  %s368_s29 = smov [#allocation2]   ;;  %s37_s25 = int_to_ptr.vmem [resolvable:$true] %s36_s25 }
   0x5   :  { %39 = dma.hbm_to_vmem [thread:$0]  %s35_s23, 16, %s37_s25, [#allocation6]  }
   0x6   :  { %s22_s30 = sshll.u32 %s368_s29, 4  ;;  %s369_s7 = smov 128   ;;  %s23_s30 = int_to_ptr.vmem [resolvable:$true] %s22_s30 }
   0x7   :  { %s370_s8 = smov 8   ;;  %s46_s10 = sshll.u32 %s456_s3, 4  ;;  %s47_s10 = int_to_ptr.hbm [resolvable:$true] %s46_s10 }
   0x8   :  { %28 = dma.hbm_to_vmem [thread:$0]  %s21_s28, 256, %s23_s30, [#allocation3], %s369_s7, %s369_s7, %s370_s8  }
   0x9   :  { %s371_s11 = smov [#allocation7]  }
   0xa   :  { %s48_s12 = sshll.u32 %s371_s11, 4  ;;  %s49_s12 = int_to_ptr.vmem [resolvable:$true] %s48_s12 }
   0xb   :  { %54 = dma.hbm_to_vmem [thread:$0]  %s47_s10, 512, %s49_s12, [#allocation6], %s369_s7, %s369_s7, %s370_s8  }
   0xc   :  { %359 = dma.done.wait [#allocation3], 256  }
   0xd   :  { %360 = vsyncadd [#allocation3], 4294967040 }
   0xe   :  { %361 = dma.done.wait [#allocation6], 528  }
   0xf   :  { %362 = vsyncadd [#allocation6], 4294966768  ;;  %vm79_vm0 = vcmask 261120   ;;  %v69_v0 = vld [vmem:[#allocation2] sm:$0xff]  ;;  %v70_v2 = vld [vmem:[#allocation2 + $0x8] sm:$0xff]  ;;  %v372_v4 = vmov 32.0  }
  0x10   :  { %v113_v1 = vsel %vm79_vm0, %v69_v0, 0.0  ;;  %v116_v3 = vsel %vm79_vm0, %v70_v2, 0.0  ;;  %233 = vrcp.f32 %v372_v4  ;;  %v74_v7 = vld [vmem:[#allocation7 + $0x18] sm:$0xff]  ;;  %v73_v8 = vld [vmem:[#allocation7 + $0x10] sm:$0xff]  ;;  %v72_v10 = vld [vmem:[#allocation7 + $0x8] sm:$0xff]  ;;  %s373_s13 = smov [#allocation8]  }
  0x11   :  { %114 = vadd.xlane.f32.xlu0 %v113_v1  ;;  %98 = vmatpush.msra.mxu0 %v74_v7  ;;  %v71_v11 = vld [vmem:[#allocation7] sm:$0xff]  ;;  %v231_v25 = vld [vmem:[%s457_s4] ss:$0 sm:$0xff]  ;;  %s182_s14 = sshll.u32 %s373_s13, 4  ;;  %s184_s17 = sshll.u32 %s458_s5, 4  ;;  %s183_s14 = int_to_ptr.vmem [resolvable:$true] %s182_s14  ;;  %s185_s17 = int_to_ptr.hbm [resolvable:$true] %s184_s17 }
  0x12   :  { %218 = vmatpush.msra.mxu1 %v74_v7  ;;  %v230_v46 = vld [vmem:[#allocation5] ss:$0 sm:$0xff]  ;;  %v232_v50 = vld [vmem:[%s455_s2] ss:$0 sm:$0xff]  ;;  %s374_s18 = smov [#allocation9]   ;;  %s197_s22 = sshll.u32 %s459_s6, 4  ;;  %s198_s22 = int_to_ptr.hbm [resolvable:$true] %s197_s22 }
  0x13   :  { %99 = vmatpush.msra.mxu0 %v73_v8  ;;  %s195_s19 = sshll.u32 %s374_s18, 4  ;;  %s196_s19 = int_to_ptr.vmem [resolvable:$true] %s195_s19 }
  0x14   :  { %219 = vmatpush.msra.mxu1 %v73_v8 }
  0x15   :  { %100 = vmatpush.msra.mxu0 %v72_v10 }
  0x16   :  { %v234_v5 = vpop.eup %233  ;;  %220 = vmatpush.msra.mxu1 %v72_v10 }
  0x17   :  { %v120_v6 = vmul.f32 32.0, %v234_v5  ;;  %101 = vmatpush.msra.mxu0 %v71_v11  ;;  %vm124_vm1 = vweird.f32 %v234_v5 }
  0x18   :  { %221 = vmatpush.msra.mxu1 %v71_v11  ;;  %216 = vmatmul.msk.f32.vlgmr.msra.gmra.mxu0 %vm79_vm0, %v69_v0 }
  0x19   :  { %117 = vadd.xlane.f32.xlu0 %v116_v3  ;;  %v121_v9 = vsub.f32 1.0, %v120_v6  ;;  %217 = vmatmul.msk.f32.vlgmr.msra.gmra.mxu1 %vm79_vm0, %v70_v2 }
  0x1b   :  { %v122_v12 = vmul.f32 %v234_v5, %v121_v9 }
  0x1d   :  { %v123_v13 = vadd.f32 %v234_v5, %v122_v12 }
  0x1f   :  { %v125_v14 = vsel %vm124_vm1, %v234_v5, %v123_v13 }
  0x84   :  { %v115_v15 = vpop.xlane.xlu0 %114 }
  0x85   :  { %v126_v16 = vmul.f32 %v125_v14, %v115_v15 }
  0x87   :  { %v128_v17 = vsub.f32 %v69_v0, %v126_v16 }
  0x89   :  { %v130_v18 = vmul.f32 %v128_v17, %v128_v17 }
  0x8b   :  { %v132_v19 = vsel %vm79_vm0, %v130_v18, 0.0 }
  0x8c   :  { %133 = vadd.xlane.f32.xlu1 %v132_v19  ;;  %v118_v20 = vpop.xlane.xlu0 %117 }
  0x8d   :  { %v127_v21 = vmul.f32 %v125_v14, %v118_v20 }
  0x8f   :  { %v129_v22 = vsub.f32 %v70_v2, %v127_v21 }
  0x91   :  { %v131_v23 = vmul.f32 %v129_v22, %v129_v22 }
  0x93   :  { %v135_v24 = vsel %vm79_vm0, %v131_v23, 0.0 }
  0x94   :  { %136 = vadd.xlane.f32.xlu1 %v135_v24 }
  0x95   :  { %v103_v27 = vpop.f32.mrf.mxu0 }
  0x96   :  { %v104_v29 = vadd.f32 %v231_v25, %v103_v27  ;;  %v106_v30 = vpop.f32.mrf.mxu1 }
  0x97   :  { %v107_v31 = vadd.f32 %v231_v25, %v106_v30 }
  0x98   :  { %v109_v33 = vadd.f32 %v104_v29, %v69_v0 }
  0x99   :  { %v110_v34 = vadd.f32 %v107_v31, %v70_v2 }
  0x9a   :  { %111 = vst.msk [vmem:[#allocation8] sm:$0xff] %vm79_vm0, %v109_v33 }
  0x9b   :  { %112 = vst.msk [vmem:[#allocation8 + $0x8] sm:$0xff] %vm79_vm0, %v110_v34 }
  0x9c   :  { %190 = dma.vmem_to_hbm [thread:$0]  %s183_s14, 256, %s185_s17, [#allocation4], %s369_s7, %s369_s7, %s370_s8  }
  0xff   :  { %v134_v26 = vpop.xlane.xlu1 %133 }
 0x100   :  { %v138_v28 = vmul.f32 %v134_v26, %v125_v14 }
 0x102   :  { %v140_v32 = vadd.f32 1e-05, %v138_v28 }
 0x104   :  { %235 = vrsqrt.f32 %v140_v32  ;;  %vm148_vm3 = vweird.f32 %v140_v32 }
 0x107   :  { %v137_v35 = vpop.xlane.xlu1 %136 }
 0x108   :  { %v139_v36 = vmul.f32 %v137_v35, %v125_v14 }
 0x10a   :  { %v236_v37 = vpop.eup %235  ;;  %v141_v38 = vadd.f32 1e-05, %v139_v36 }
 0x10b   :  { %v143_v39 = vmul.f32 %v236_v37, %v140_v32  ;;  %vm149_vm2 = vweird.f32 %v236_v37 }
 0x10c   :  { %237 = vrsqrt.f32 %v141_v38  ;;  %vm150_vm4 = vmor %vm148_vm3, %vm149_vm2  ;;  %vm158_vm6 = vweird.f32 %v141_v38 }
 0x10d   :  { %v144_v40 = vmul.f32 %v236_v37, %v143_v39 }
 0x10f   :  { %v145_v41 = vmul.f32 0.5, %v144_v40 }
 0x111   :  { %v146_v42 = vsub.f32 1.5, %v145_v41 }
 0x112   :  { %v238_v43 = vpop.eup %237 }
 0x113   :  { %v147_v44 = vmul.f32 %v236_v37, %v146_v42  ;;  %v153_v45 = vmul.f32 %v238_v43, %v141_v38  ;;  %vm159_vm5 = vweird.f32 %v238_v43 }
 0x114   :  { %vm160_vm7 = vmor %vm158_vm6, %vm159_vm5 }
 0x115   :  { %v151_v47 = vsel %vm150_vm4, %v236_v37, %v147_v44  ;;  %v154_v48 = vmul.f32 %v238_v43, %v153_v45 }
 0x116   :  { %v162_v49 = vmul.f32 %v151_v47, %v128_v17 }
 0x117   :  { %v155_v51 = vmul.f32 0.5, %v154_v48 }
 0x118   :  { %v168_v52 = vmul.f32 %v230_v46, %v162_v49 }
 0x119   :  { %v156_v53 = vsub.f32 1.5, %v155_v51 }
 0x11a   :  { %v174_v54 = vadd.f32 %v232_v50, %v168_v52 }
 0x11b   :  { %v157_v55 = vmul.f32 %v238_v43, %v156_v53 }
 0x11c   :  { %176 = vst.msk [vmem:[#allocation9] sm:$0xff] %vm79_vm0, %v174_v54 }
 0x11d   :  { %v161_v56 = vsel %vm160_vm7, %v238_v43, %v157_v55 }
 0x11e   :  { %v163_v57 = vmul.f32 %v161_v56, %v129_v22 }
 0x120   :  { %v169_v58 = vmul.f32 %v230_v46, %v163_v57 }
 0x122   :  { %v175_v59 = vadd.f32 %v232_v50, %v169_v58 }
 0x124   :  { %177 = vst.msk [vmem:[#allocation9 + $0x8] sm:$0xff] %vm79_vm0, %v175_v59 }
 0x125   :  { %203 = dma.vmem_to_hbm [thread:$0]  %s196_s19, 256, %s198_s22, [#allocation10], %s369_s7, %s369_s7, %s370_s8  }
 0x126   :  { %363 = dma.done.wait [#allocation4], 256  }
 0x127   :  { %364 = vsyncadd [#allocation4], 4294967040 }
 0x128   :  { %365 = dma.done.wait [#allocation10], 256  }
 0x129   :  { %366 = vsyncadd [#allocation10], 4294967040 }
 0x12a   :  { %212 = vsyncpa [#allocation3], 1 }
 0x12b   :  { %213 = vsyncpa [#allocation6], 1 }
 0x12c   :  { %214 = vsyncpa [#allocation4], 1 }
 0x12d   :  { %215 = vsyncpa [#allocation10], 1 }

</bundles_post_ra>
